<compile_context>
chip_gen: v5e
topology: v5e:2x2
jax: 0.10.0
libtpu: 0.0.40
codegen_flags: <defaults>
</compile_context>

<pallas_src>
import functools
import math

import jax
import jax.numpy as jnp
from jax.experimental import pallas as pl
from jax.experimental.pallas import tpu as pltpu

LANE = 128
VMEM_LIMIT_BYTES = 48 * 1024 * 1024  # > 16/32 MiB defaults, < v7x 64 MiB/TC


def _round_up(x, m):
    return ((x + m - 1) // m) * m


# ----------------------------------------------------------------------------
# Pallas kernels
# ----------------------------------------------------------------------------
def _feat_transform_kernel(x_ref, w_ref, y_ref, z_ref, *, d_out_pad):
    # x_ref: (tm, d_in_pad)          bf16
    # w_ref: (d_in_pad, 2*d_out_pad) bf16 == [Wn^T | Ws^T]  (fused, VMEM-resident)
    # y_ref: (tm, d_out_pad) bf16    neighbor-transformed features (X @ Wn^T)
    # z_ref: (tm, d_out_pad) f32     self-transformed features     (X @ Ws^T)
    yz = jnp.dot(x_ref[...], w_ref[...], preferred_element_type=jnp.float32)
    y_ref[...] = yz[:, :d_out_pad].astype(y_ref.dtype)
    z_ref[...] = yz[:, d_out_pad:].astype(z_ref.dtype)


def _sage_aggregate_kernel(a_ref, y_ref, z_ref, invdeg_ref, o_ref, acc_ref, *,
                           epilogue, d_out_true, tk, y_resident):
    # a_ref     : (tm, tk)           int8  {0,1} adjacency tile (dst, src)
    # y_ref     : (n_pad|tk, d_out_pad) bf16  (X @ Wn^T); resident or K-streamed
    # z_ref     : (tm, d_out_pad)    f32   (X_dst @ Ws^T) self term
    # invdeg_ref: (tm, 1)            f32   1 / max(deg, 1) per dst row
    # o_ref     : (tm, d_out_pad)    bf16 (hidden) / f32 (final)
    # acc_ref   : (tm, d_out_pad)    f32   VMEM accumulator (resident across K)
    k = pl.program_id(1)

    @pl.when(k == 0)
    def _init():
        acc_ref[...] = jnp.zeros_like(acc_ref)

    if y_resident:
        start = pl.multiple_of(k * tk, tk)
        y_tile = y_ref[pl.ds(start, tk), :]
    else:
        y_tile = y_ref[...]

    # {0,1} int8 -> bf16 is exact; MXU bf16 path works on every generation.
    acc_ref[...] += jnp.dot(a_ref[...].astype(jnp.bfloat16), y_tile,
                            preferred_element_type=jnp.float32)

    @pl.when(k == pl.num_programs(1) - 1)
    def _finalize():
        # exact mean: f32 per-row 1/deg scale, then add the self term
        acc = acc_ref[...] * invdeg_ref[...] + z_ref[...]
        if epilogue == "relu":
            out = jnp.maximum(acc, 0.0)
        else:  # fused, masked log_softmax over the first d_out_true lanes
            col = jax.lax.broadcasted_iota(jnp.int32, acc.shape, 1)
            mask = col < d_out_true
            masked = jnp.where(mask, acc, -jnp.inf)       # mask BEFORE exp
            m = jnp.max(masked, axis=-1, keepdims=True)
            e = jnp.exp(masked - m)                       # padded lanes -> 0
            lse = jnp.log(jnp.sum(e, axis=-1, keepdims=True))
            out = jnp.where(mask, acc - m - lse, 0.0)
        o_ref[...] = out.astype(o_ref.dtype)


# ----------------------------------------------------------------------------
# Wrappers
# ----------------------------------------------------------------------------
def feat_transform(x_pad, w_cat, d_out_pad, *, tm):
    """Y = X @ Wn^T (bf16), Z = X @ Ws^T (f32) in one fused matmul."""
    n_pad, d_in_pad = x_pad.shape
    grid = (n_pad // tm,)
    kernel = functools.partial(_feat_transform_kernel, d_out_pad=d_out_pad)
    return pl.pallas_call(
        kernel,
        out_shape=(jax.ShapeDtypeStruct((n_pad, d_out_pad), jnp.bfloat16),
                   jax.ShapeDtypeStruct((n_pad, d_out_pad), jnp.float32)),
        grid=grid,
        in_specs=[
            pl.BlockSpec((tm, d_in_pad), lambda i: (i, 0)),
            pl.BlockSpec((d_in_pad, 2 * d_out_pad), lambda i: (0, 0)),  # resident
        ],
        out_specs=(pl.BlockSpec((tm, d_out_pad), lambda i: (i, 0)),
                   pl.BlockSpec((tm, d_out_pad), lambda i: (i, 0))),
        compiler_params=pltpu.CompilerParams(
            dimension_semantics=("parallel",),
            vmem_limit_bytes=VMEM_LIMIT_BYTES),
    )(x_pad, w_cat)


def sage_aggregate(a01, y16, z, inv_deg, *, epilogue, d_out_true, tm, tk,
                   out_dtype, y_resident_max_bytes=16 * 1024 * 1024):
    """out = epilogue(inv_deg * (A01 @ Y) + Z), K-tiled, fused epilogue."""
    n_pad = a01.shape[0]
    d_out_pad = y16.shape[1]
    grid = (n_pad // tm, n_pad // tk)

    # Keep Y fully VMEM-resident (DMA'd once) whenever it fits the budget;
    # otherwise stream K tiles (larger tm already cuts the re-read factor).
    y_resident = (n_pad * d_out_pad * 2) <= y_resident_max_bytes
    if y_resident:
        y_spec = pl.BlockSpec((n_pad, d_out_pad), lambda i, k: (0, 0))
    else:
        y_spec = pl.BlockSpec((tk, d_out_pad), lambda i, k: (k, 0))

    kernel = functools.partial(_sage_aggregate_kernel, epilogue=epilogue,
                               d_out_true=d_out_true, tk=tk,
                               y_resident=y_resident)
    return pl.pallas_call(
        kernel,
        out_shape=jax.ShapeDtypeStruct((n_pad, d_out_pad), out_dtype),
        grid=grid,
        in_specs=[
            pl.BlockSpec((tm, tk), lambda i, k: (i, k)),           # A01 tile
            y_spec,                                                # Y
            pl.BlockSpec((tm, d_out_pad), lambda i, k: (i, 0)),    # Z (dst tile)
            pl.BlockSpec((tm, 1), lambda i, k: (i, 0)),            # 1/deg
        ],
        out_specs=pl.BlockSpec((tm, d_out_pad), lambda i, k: (i, 0)),
        scratch_shapes=[pltpu.VMEM((tm, d_out_pad), jnp.float32)],
        compiler_params=pltpu.CompilerParams(
            dimension_semantics=("parallel", "arbitrary"),
            vmem_limit_bytes=VMEM_LIMIT_BYTES),
    )(a01, y16, z, inv_deg)


# ----------------------------------------------------------------------------
# Model: parameter init + packing + graph prep + forward (glue in plain JAX)
# ----------------------------------------------------------------------------
def xavier_uniform(key, shape, gain):
    fan_out, fan_in = shape  # torch Linear weight is (out, in)
    bound = gain * math.sqrt(6.0 / (fan_in + fan_out))
    return jax.random.uniform(key, shape, jnp.float32, -bound, bound)


def init_graphsage_params(key, in_feats, hidden_feats, out_feats, num_layers):
    gain = math.sqrt(2.0)  # nn.init.calculate_gain('relu')
    if num_layers > 1:
        dims = [in_feats] + [hidden_feats] * (num_layers - 1) + [out_feats]
    else:
        dims = [in_feats, out_feats]
    params = []
    for l in range(num_layers):
        key, k1, k2 = jax.random.split(key, 3)
        d_in, d_out = dims[l], dims[l + 1]
        w_self = xavier_uniform(k1, (d_out, d_in), gain)    # fc_self.weight
        w_neigh = xavier_uniform(k2, (d_out, d_in), gain)   # fc_neigh.weight
        params.append((w_self, w_neigh))
    return params


def pack_params(params):
    """Pad feature dims to lane multiples, transpose, cast bf16, fuse weights."""
    packed = []
    for (w_self, w_neigh) in params:
        d_out, d_in = w_self.shape
        d_in_p = _round_up(d_in, LANE)
        d_out_p = _round_up(d_out, LANE)
        wn_t = jnp.zeros((d_in_p, d_out_p), jnp.bfloat16)
        wn_t = wn_t.at[:d_in, :d_out].set(w_neigh.T.astype(jnp.bfloat16))
        ws_t = jnp.zeros((d_in_p, d_out_p), jnp.bfloat16)
        ws_t = ws_t.at[:d_in, :d_out].set(w_self.T.astype(jnp.bfloat16))
        w_cat = jnp.concatenate([wn_t, ws_t], axis=1)   # (d_in_p, 2*d_out_p)
        packed.append((w_cat, d_out_p, d_out))
    return packed


def prepare_block(adj, n_pad):
    """Build the padded {0,1} int8 adjacency + f32 1/deg vector ONCE per graph
    (hoisted out of the per-layer loop)."""
    n_dst, n_src = adj.shape
    a01 = (adj != 0).astype(jnp.float32)
    deg = jnp.sum(a01, axis=1)
    inv = (1.0 / jnp.maximum(deg, 1.0)).astype(jnp.float32)  # DGL mean; deg=0 -> 0
    a01_p = jnp.zeros((n_pad, n_pad), jnp.int8)
    a01_p = a01_p.at[:n_dst, :n_src].set(a01.astype(jnp.int8))
    inv_p = jnp.ones((n_pad, 1), jnp.float32)
    inv_p = inv_p.at[:n_dst, 0].set(inv)
    return a01_p, inv_p


def graphsage_forward(prepped_blocks, x, packed_params, *, tm=512, tk=512,
                      y_resident_max_bytes=16 * 1024 * 1024):
    """prepped_blocks: list of (a01_int8_padded, inv_deg_padded) per layer.

    tm = tk = 512 defaults on every generation (v5e/v6e/v7x); raise further if
    VMEM allows -- the aggregate step is HBM/overhead-bound, not MXU-bound.
    """
    n, d_in = x.shape
    n_layers = len(packed_params)
    n_pad = prepped_blocks[0][0].shape[0]
    d_in_pad = packed_params[0][0].shape[0]

    # activations stay bf16 end-to-end (the MXU would down-cast anyway)
    x_pad = jnp.zeros((n_pad, d_in_pad), jnp.bfloat16)
    x_pad = x_pad.at[:n, :d_in].set(x.astype(jnp.bfloat16))

    h = x_pad
    for l, ((a01, inv_deg), (w_cat, d_out_pad, d_out_true)) in enumerate(
            zip(prepped_blocks, packed_params)):
        last = (l == n_layers - 1)
        y16, z = feat_transform(h, w_cat, d_out_pad, tm=tm)
        h = sage_aggregate(
            a01, y16, z, inv_deg,
            epilogue=("log_softmax" if last else "relu"),
            d_out_true=d_out_true, tm=tm, tk=tk,
            out_dtype=(jnp.float32 if last else jnp.bfloat16),
            y_resident_max_bytes=y_resident_max_bytes)
        # dropout: inference mode -> identity
    return h[:n, :packed_params[-1][2]].astype(jnp.float32)


# ----------------------------------------------------------------------------
# Pure-JAX references for correctness checks
# ----------------------------------------------------------------------------
def graphsage_reference_f32(adjs, x, params):
    n_layers = len(params)
    h = x
    for l, (adj, (w_self, w_neigh)) in enumerate(zip(adjs, params)):
        a01 = (adj != 0).astype(jnp.float32)
        deg = jnp.sum(a01, axis=1, keepdims=True)
        a_norm = a01 / jnp.maximum(deg, 1.0)
        h = h @ w_self.T + (a_norm @ h) @ w_neigh.T
        if l != n_layers - 1:
            h = jnp.maximum(h, 0.0)
    return jax.nn.log_softmax(h, axis=-1)


def graphsage_reference_bf16(adjs, x, params):
    """Emulates the kernel's precision choices (bf16 operands, f32 accum,
    exact {0,1} adjacency with f32 1/deg scaling, bf16 hidden activations)."""
    n_layers = len(params)
    h = x.astype(jnp.float32)
    for l, (adj, (w_self, w_neigh)) in enumerate(zip(adjs, params)):
        a01 = (adj != 0).astype(jnp.float32)
        deg = jnp.sum(a01, axis=1, keepdims=True)
        inv = 1.0 / jnp.maximum(deg, 1.0)
        h16 = h.astype(jnp.bfloat16)
        y = jnp.dot(h16, w_neigh.T.astype(jnp.bfloat16),
                    preferred_element_type=jnp.float32)
        y16 = y.astype(jnp.bfloat16)
        z = jnp.dot(h16, w_self.T.astype(jnp.bfloat16),
                    preferred_element_type=jnp.float32)
        s = jnp.dot(a01.astype(jnp.bfloat16), y16,
                    preferred_element_type=jnp.float32)
        h = inv * s + z
        if l != n_layers - 1:
            h = jnp.maximum(h, 0.0).astype(jnp.bfloat16).astype(jnp.float32)
    return jax.nn.log_softmax(h, axis=-1)


# ----------------------------------------------------------------------------
if __name__ == "__main__":
    key = jax.random.PRNGKey(0)

    # small, SAGE-consistent shapes (exercise padding + multi-step grid)
    N = 600
    in_feats = 100
    hidden_feats = 64
    out_feats = 10
    num_layers = 2
    tm = tk = 512  # n_pad = 1024 -> 2x2 aggregate grid (dst parallel, K accum)

    key, k_adj, k_x, k_p = jax.random.split(key, 4)
    adj = jax.random.bernoulli(k_adj, p=0.05, shape=(N, N)).astype(jnp.float32)
    x = jax.random.normal(k_x, (N, in_feats), jnp.float32)
    params = init_graphsage_params(k_p, in_feats, hidden_feats, out_feats,
                                   num_layers)
    packed = pack_params(params)

    n_pad = _round_up(N, (tm * tk) // math.gcd(tm, tk))
    prep = prepare_block(adj, n_pad)           # built once, reused per layer
    blocks_prepped = [prep] * num_layers
    adjs = [adj] * num_layers

    # default path: Y fully VMEM-resident
    out = graphsage_forward(blocks_prepped, x, packed, tm=tm, tk=tk)
    out = jax.block_until_ready(out)
    assert out.shape == (N, out_feats)

    # also exercise the K-streamed Y fallback path
    out_stream = graphsage_forward(blocks_prepped, x, packed, tm=tm, tk=tk,
                                   y_resident_max_bytes=0)
    out_stream = jax.block_until_ready(out_stream)

    ref16 = graphsage_reference_bf16(adjs, x, params)
    ref32 = graphsage_reference_f32(adjs, x, params)
    for o in (out, out_stream):
        assert jnp.allclose(o, ref16, atol=2e-2, rtol=2e-2), \
            "mismatch vs bf16-emulating reference"
        assert jnp.allclose(o, ref32, atol=1.5e-1, rtol=1.5e-1), \
            "mismatch vs f32 reference"

    print("KERNEL_OK")
</pallas_src>

<mosaic_0001>
module attributes {stable_mosaic.version = 11 : i64} {
  func.func @_feat_transform_kernel(%arg0: i32, %arg1: memref<512x128xbf16, #tpu.memory_space<vmem>>, %arg2: memref<128x256xbf16, #tpu.memory_space<vmem>>, %arg3: memref<512x128xbf16, #tpu.memory_space<vmem>>, %arg4: memref<512x128xf32, #tpu.memory_space<vmem>>) attributes {dimension_semantics = [#tpu.dimension_semantics<parallel>], iteration_bounds = array<i64: 2>, scalar_prefetch = 0 : i64, scratch_operands = 0 : i64, tpu.core_type = #tpu.core_type<tc>, window_params = [{transform_indices = @transform_0, window_bounds = array<i64: 512, 128>}, {pipeline_mode = #tpu.pipeline_mode<synchronous>, transform_indices = @transform_1, window_bounds = array<i64: 128, 256>}, {transform_indices = @transform_2, window_bounds = array<i64: 512, 128>}, {transform_indices = @transform_3, window_bounds = array<i64: 512, 128>}]} {
    %c0 = arith.constant 0 : index
    %c0_0 = arith.constant 0 : index
    %0 = vector.load %arg1[%c0, %c0_0] : memref<512x128xbf16, #tpu.memory_space<vmem>>, vector<512x128xbf16>
    %c0_1 = arith.constant 0 : index
    %c0_2 = arith.constant 0 : index
    %1 = vector.load %arg2[%c0_1, %c0_2] : memref<128x256xbf16, #tpu.memory_space<vmem>>, vector<128x256xbf16>
    %cst = arith.constant dense<0.000000e+00> : vector<512x256xf32>
    %2 = tpu.matmul %0, %1, %cst {dimension_numbers = #tpu.dot_dimension_numbers<[1], [0], [0], [1], [0, 0, 1, 1], [], []>} : vector<512x128xbf16>, vector<128x256xbf16>, vector<512x256xf32> -> vector<512x256xf32>
    %3 = vector.extract_strided_slice %2 {offsets = [0, 0], sizes = [512, 128], strides = [1, 1]} : vector<512x256xf32> to vector<512x128xf32>
    %4 = arith.truncf %3 : vector<512x128xf32> to vector<512x128xbf16>
    %c0_3 = arith.constant 0 : index
    %c0_4 = arith.constant 0 : index
    %5 = vector.load %arg3[%c0_3, %c0_4] : memref<512x128xbf16, #tpu.memory_space<vmem>>, vector<512x128xbf16>
    tpu.vector_store %arg3[%c0_3, %c0_4], %4 {strides = array<i32>} : memref<512x128xbf16, #tpu.memory_space<vmem>>, vector<512x128xbf16>,
    %6 = vector.extract_strided_slice %2 {offsets = [0, 128], sizes = [512, 128], strides = [1, 1]} : vector<512x256xf32> to vector<512x128xf32>
    %c0_5 = arith.constant 0 : index
    %c0_6 = arith.constant 0 : index
    %7 = vector.load %arg4[%c0_5, %c0_6] : memref<512x128xf32, #tpu.memory_space<vmem>>, vector<512x128xf32>
    tpu.vector_store %arg4[%c0_5, %c0_6], %6 {strides = array<i32>} : memref<512x128xf32, #tpu.memory_space<vmem>>, vector<512x128xf32>,
    return
  }
  func.func @transform_0(%arg0: i32) -> (i32, i32) {
    %c0_i32 = arith.constant 0 : i32
    %c0_i32_0 = arith.constant 0 : i32
    return %arg0, %c0_i32 : i32, i32
  }
  func.func @transform_1(%arg0: i32) -> (i32, i32) {
    %c0_i32 = arith.constant 0 : i32
    %c0_i32_0 = arith.constant 0 : i32
    %c0_i32_1 = arith.constant 0 : i32
    return %c0_i32, %c0_i32_0 : i32, i32
  }
  func.func @transform_2(%arg0: i32) -> (i32, i32) {
    %c0_i32 = arith.constant 0 : i32
    %c0_i32_0 = arith.constant 0 : i32
    return %arg0, %c0_i32 : i32, i32
  }
  func.func @transform_3(%arg0: i32) -> (i32, i32) {
    %c0_i32 = arith.constant 0 : i32
    %c0_i32_0 = arith.constant 0 : i32
    return %arg0, %c0_i32 : i32, i32
  }
}

</mosaic_0001>

<bundles_post_ra>
// kernel: tpu_custom_call.1
= control target key start
LH: loop header
LB: loop body
LE: loop exit
PB: predicated region body
PF: predicated region fallthrough
CT: control target
= control target key end

     0   :  { %9 = vsyncpa [#allocation3], 0  ;;  %s2297_s0 = inlined_call_operand.hbm [shape: bf16[1024,128], index: 0, kind: input, shape index: {}]   ;;  %s2298_s1 = inlined_call_operand.hbm [shape: bf16[128,256], index: 1, kind: input, shape index: {}]   ;;  %s2299_s2 = inlined_call_operand.hbm [shape: bf16[1024,128], index: 2, kind: output, shape index: {0}]   ;;  %s2300_s3 = inlined_call_operand.hbm [shape: f32[1024,128], index: 3, kind: output, shape index: {1}]  }
   0x1   :  { %11 = vsyncpa [#allocation3 + $0x1], 0 }
   0x2   :  { %12 = vsyncpa [#allocation6], 0 }
   0x3   :  { %13 = vsyncpa [#allocation4], 0 }
   0x4   :  { %15 = vsyncpa [#allocation4 + $0x1], 0 }
   0x5   :  { %16 = vsyncpa [#allocation9], 0 }
   0x6   :  { %18 = vsyncpa [#allocation9 + $0x1], 0  ;;  %s1991_s12 = smov 0   ;;  %s1993_s13 = smov 0  }
   0x7   :  { %s1995_s14 = smov 0   ;;  %s1997_s15 = smov 0  }
   0x8 LB: > { %s2012_s16 = sadd.s32 4294967295, %s1960_s15   ;;  %s1258_s17 = sadd.s32 4294967294, %s1960_s15   ;;  %s1960_s15 = sphi %s1997_s15, %s2310_s15   ;;  %s1956_s14 = sphi %s1995_s14, %s2309_s14   ;;  %s1952_s13 = sphi %s1993_s13, %s2308_s13   ;;  %s1948_s12 = sphi %s1991_s12, %s2307_s12  }
   0x9   : > { %p44_p0 = scmp.ne.s32.totalorder %s1952_s13, %s1948_s12  ;;  %p45_p1 = scmp.eq.s32.totalorder %s2012_s16, 0 }
   0xa   : > { %p89_p2 = scmp.eq.s32.totalorder %s2012_s16, 1  ;;  %p95_p3 = scmp.eq.s32.totalorder %s1258_s17, 1 }
   0xb   : > { %p2021_p4 = por %p45_p1, %p44_p0  ;;  %p1259_p5 = scmp.ge.s32.totalorder %s1960_s15, 1 }
   0xc   : > { %p2026_p6 = por %p95_p3, %p44_p0  ;;  %p128_p7 = scmp.lt.s32.totalorder %s1960_s15, 3 }
   0xd   : > { %s139_s22 = sshll.u32 %s2298_s1, 4  ;;  %s1962_s24 = smov [#allocation5]   ;;  %s140_s22 = int_to_ptr.hbm [resolvable:$true] %s139_s22 }
   0xe   : > { %p2034_p8 = pnand %p1259_p5, %p128_p7  ;;  %s141_s25 = sshll.u32 %s1962_s24, 4  ;;  %s142_s25 = int_to_ptr.vmem [resolvable:$true] %s141_s25 }
   0xf   : > { %s2044_s26 = sadd.s32 1, %s1960_s15   ;;  %s1963_s27 = smov 128  }
  0x10   : > { %p1738_p9 = pneg %p2034_p8  ;;  %s1964_s28 = smov 8  }
  0x11   : > { %s28_s29 = ssub.s32 %s1960_s15, %s2044_s26  ;;  %s31_s30 = sadd.s32 1, %s1956_s14 }
  0x12   : > { %p1739_p10 = pnand %p1738_p9, %p45_p1  ;;  %p29_p12 = scmp.eq.s32.totalorder %s28_s29, 0 }
  0x13   : > { %p38_p13 = scmp.ne.s32.totalorder %s1956_s14, %s1952_s13  ;;  %p39_p0 = scmp.eq.s32.totalorder %s1960_s15, 0 }
  0x14   : > { %1741 = dma.hbm_to_vmem [thread:$0]  (!%p1739_p10), %s140_s22, 2048, %s142_s25, [#allocation6], %s1963_s27, %s1963_s27, %s1964_s28  }
  0x15   : > { %p1754_p3 = scmp.lt.s32.totalorder %s1960_s15, 2  ;;  %p40_p5 = por %p39_p0, %p38_p13 }
  0x16   : > { %s2054_s4 = scalar_select %p29_p12, %s1956_s14, %s31_s30  }
  0x17   : > { %p2058_p7 = por %p89_p2, %p38_p13  ;;  %s155_s6 = sand.u32 1, %s1956_s14  }
  0x18   : > { %s1470_s7 = sshll.u32 %s1960_s15, 8  ;;  %s1262_s8 = sshll.u32 %s155_s6, 8 }
  0x19   : > { %s164_s11 = scalar_lea.hbm %s2297_s0, %s1470_s7  ;;  %s159_s20 = scalar_lea.vmem [#allocation2], %s1262_s8 }
  0x1a   : > { %s165_s17 = sshll.u32 %s164_s11, 4  ;;  %s167_s21 = sshll.u32 %s159_s20, 4  ;;  %s166_s17 = int_to_ptr.hbm [resolvable:$true] %s165_s17  ;;  %s168_s21 = int_to_ptr.vmem [resolvable:$true] %s167_s21 }
  0x1b   : > { %p2069_p9 = pnand %p1754_p3, %p40_p5  ;;  %s156_s24 = scalar_lea.sflag [#allocation3], %s155_s6 }
  0x1c   : > { %s1828_s25 = sshra.s32 %s166_s17, 4  ;;  %s1835_s30 = scalar_lea.hbm %s2297_s0, 512  ;;  %s1829_s25 = int_to_ptr.hbm [resolvable:$true] %s1828_s25 }
  0x1d   : > { %s1830_s27 = scalar_lea.hbm %s1829_s25, 256  ;;  %p1832_p10 = pneg %p2069_p9 }
  0x1e   : > { %p1831_p2 = scmp.ne.s32.totalorder %s1829_s25, %s1830_s27  ;;  %p1836_p0 = scmp.lt.s32.totalorder %s1829_s25, %s2297_s0 }
  0x1f   : > { %p1837_p3 = scmp.lt.s32.totalorder %s1835_s30, %s1830_s27 }
  0x20   : > { %p1833_p12 = pnand %p1832_p10, %p1831_p2 }
  0x21   : > { %p1838_p5 = por %p1837_p3, %p1836_p0 }
  0x22   : > { %p1834_p13 = pneg %p1833_p12 }
  0x24   : > { %p1839_p11 = pnand %p1838_p5, %p1834_p13 }
  0x26   : > { %1842 = shalt.err (!%p1839_p11)
}
  0x27   : > { %s1965_s6 = smov 64   ;;  %s1966_s9 = smov 4  }
  0x28   : > { %1745 = dma.hbm_to_vmem [thread:$0]  (!%p2069_p9), %s166_s17, 4096, %s168_s21, %s156_s24, %s1965_s6, %s1965_s6, %s1966_s9  }
  0x29   : > { %179 = sbr.rel (%p2034_p8) target bundleno = 482 (0x1e2), region = 28  ;;  %s2086_s10 = sand.u32 (!%p2034_p8), 1, %s1952_s13  }
  0x2a   : > { %s1266_s11 = sshll.u32 (!%p2034_p8), %s2086_s10, 8  ;;  %s182_s20 = scalar_lea.sflag (!%p2034_p8), [#allocation3], %s2086_s10 }
  0x2b   : > { %s2092_s25 = scalar_lea.vmem (!%p2034_p8), [#allocation2], %s1266_s11 }
  0x2e   : > { %1931 = dma.done.wait (%p2021_p4), %s182_s20, 4096  }
  0x2f   : > { %1933 = vsyncadd (%p2021_p4), %s182_s20, 4294963200 }
  0x30   : > { %1935 = dma.done.wait (%p45_p1), [#allocation6], 2048  }
  0x31   : > { %1937 = vsyncadd (%p45_p1), [#allocation6], 4294965248  ;;  %v1456_v0 = vld [vmem:[#allocation5 + $0x70] sm:$0xf]  ;;  %v1518_v1 = vld [vmem:[#allocation5 + $0x74] sm:$0xf0] }
  0x32   : > { %v1517_v2 = vld [vmem:[#allocation5 + $0x74] sm:$0xf]  ;;  %v1457_v3 = vor.u32 %v1518_v1, %v1456_v0  ;;  %v1458_v4 = vld [vmem:[#allocation5 + $0x78] sm:$0xf0]  ;;  %v1448_v5 = vld [vmem:[#allocation5 + $0x60] sm:$0xf] }
  0x33   : > { %v1516_v6 = vld [vmem:[#allocation5 + $0x64] sm:$0xf0]  ;;  %v1461_v7 = vor.u32 %v1517_v2, %v1458_v4  ;;  %v1515_v8 = vld [vmem:[#allocation5 + $0x64] sm:$0xf]  ;;  %v1450_v9 = vld [vmem:[#allocation5 + $0x68] sm:$0xf0] }
  0x34   : > { %574 = vmatpush.bf16.msra.mxu0 %v1457_v3  ;;  %1712 = vmatpush.bf16.msra.mxu2 %v1457_v3  ;;  %v1449_v10 = vor.u32 %v1516_v6, %v1448_v5  ;;  %v1453_v11 = vor.u32 %v1515_v8, %v1450_v9  ;;  %v1440_v12 = vld [vmem:[#allocation5 + $0x50] sm:$0xf]  ;;  %v1514_v13 = vld [vmem:[#allocation5 + $0x54] sm:$0xf0]  ;;  %v1513_v14 = vld [vmem:[#allocation5 + $0x54] sm:$0xf] }
  0x35   : > { %743 = vmatpush.bf16.msra.mxu1 %v1461_v7  ;;  %1720 = vmatpush.bf16.msra.mxu3 %v1461_v7  ;;  %v1442_v15 = vld [vmem:[#allocation5 + $0x58] sm:$0xf0]  ;;  %v1441_v16 = vor.u32 %v1514_v13, %v1440_v12  ;;  %v1432_v18 = vld [vmem:[#allocation5 + $0x40] sm:$0xf]  ;;  %v1512_v19 = vld [vmem:[#allocation5 + $0x44] sm:$0xf0] }
  0x36   : > { %v1445_v17 = vor.u32 %v1513_v14, %v1442_v15  ;;  %v1511_v20 = vld [vmem:[#allocation5 + $0x44] sm:$0xf]  ;;  %v1434_v21 = vld [vmem:[#allocation5 + $0x48] sm:$0xf0]  ;;  %v1433_v22 = vor.u32 %v1512_v19, %v1432_v18  ;;  %v1424_v24 = vld [vmem:[#allocation5 + $0x30] sm:$0xf] }
  0x37   : > { %v1437_v23 = vor.u32 %v1511_v20, %v1434_v21  ;;  %v1510_v25 = vld [vmem:[#allocation5 + $0x34] sm:$0xf0]  ;;  %v1509_v26 = vld [vmem:[#allocation5 + $0x34] sm:$0xf]  ;;  %v1426_v27 = vld [vmem:[#allocation5 + $0x38] sm:$0xf0] }
  0x38   : > { %575 = vmatpush.bf16.msra.mxu0 %v1449_v10  ;;  %1713 = vmatpush.bf16.msra.mxu2 %v1449_v10  ;;  %v1425_v28 = vor.u32 %v1510_v25, %v1424_v24  ;;  %v1429_v29 = vor.u32 %v1509_v26, %v1426_v27  ;;  %v1416_v30 = vld [vmem:[#allocation5 + $0x20] sm:$0xf]  ;;  %v1508_v31 = vld [vmem:[#allocation5 + $0x24] sm:$0xf0]  ;;  %v1507_v32 = vld [vmem:[#allocation5 + $0x24] sm:$0xf] }
  0x39   : > { %744 = vmatpush.bf16.msra.mxu1 %v1453_v11  ;;  %1721 = vmatpush.bf16.msra.mxu3 %v1453_v11  ;;  %v1418_v33 = vld [vmem:[#allocation5 + $0x28] sm:$0xf0]  ;;  %v1417_v34 = vor.u32 %v1508_v31, %v1416_v30  ;;  %v1408_v36 = vld [vmem:[#allocation5 + $0x10] sm:$0xf]  ;;  %v1506_v37 = vld [vmem:[#allocation5 + $0x14] sm:$0xf0] }
  0x3a   : > { %v1421_v35 = vor.u32 %v1507_v32, %v1418_v33  ;;  %v1505_v38 = vld [vmem:[#allocation5 + $0x14] sm:$0xf]  ;;  %v1410_v39 = vld [vmem:[#allocation5 + $0x18] sm:$0xf0]  ;;  %v1409_v40 = vor.u32 %v1506_v37, %v1408_v36  ;;  %v1400_v42 = vld [vmem:[#allocation5] sm:$0xf] }
  0x3b   : > { %v1413_v41 = vor.u32 %v1505_v38, %v1410_v39  ;;  %v1504_v43 = vld [vmem:[#allocation5 + $0x4] sm:$0xf0]  ;;  %v1503_v44 = vld [vmem:[#allocation5 + $0x4] sm:$0xf]  ;;  %v1402_v45 = vld [vmem:[#allocation5 + $0x8] sm:$0xf0] }
  0x3c   : > { %576 = vmatpush.bf16.msra.mxu0 %v1441_v16  ;;  %1714 = vmatpush.bf16.msra.mxu2 %v1441_v16  ;;  %v1401_v46 = vor.u32 %v1504_v43, %v1400_v42  ;;  %v1405_v47 = vor.u32 %v1503_v44, %v1402_v45  ;;  %v1471_v48 = vld [vmem:[%s2092_s25] sm:$0xff]  ;;  %v1472_v50 = vld [vmem:[%s2092_s25 + $0x8] sm:$0xff]  ;;  %v1473_v52 = vld [vmem:[%s2092_s25 + $0x10] sm:$0xff]  ;;  %s1269_s18 = sshll.u32 %s2086_s10, 9  ;;  %s2128_s17 = scalar_lea.vmem [#allocation7], %s1266_s11 }
  0x3d   : > { %745 = vmatpush.bf16.msra.mxu1 %v1445_v17  ;;  %1722 = vmatpush.bf16.msra.mxu3 %v1445_v17  ;;  %v1487_v49 = vld [vmem:[%s2092_s25 + $0x80] sm:$0xff]  ;;  %v1488_v51 = vld [vmem:[%s2092_s25 + $0x88] sm:$0xff]  ;;  %v1489_v53 = vld [vmem:[%s2092_s25 + $0x90] sm:$0xff]  ;;  %s2121_s23 = scalar_lea.vmem [#allocation8], %s1269_s18  ;;  %s1519_s21 = sshll.u32 %s2012_s16, 8 }
  0x3e   : > { %v1474_v54 = vld [vmem:[%s2092_s25 + $0x18] sm:$0xff]  ;;  %v1475_v56 = vld [vmem:[%s2092_s25 + $0x20] sm:$0xff]  ;;  %v1476_v58 = vld [vmem:[%s2092_s25 + $0x28] sm:$0xff]  ;;  %s1520_s22 = sshll.u32 %s2012_s16, 9  ;;  %s1121_s28 = scalar_lea.hbm %s2299_s2, %s1519_s21 }
  0x3f   : > { %v1490_v55 = vld [vmem:[%s2092_s25 + $0x98] sm:$0xff]  ;;  %v1491_v57 = vld [vmem:[%s2092_s25 + $0xa0] sm:$0xff]  ;;  %v1492_v59 = vld [vmem:[%s2092_s25 + $0xa8] sm:$0xff]  ;;  %s1122_s29 = sshll.u32 %s2128_s17, 4  ;;  %s1138_s8 = scalar_lea.hbm %s2300_s3, %s1520_s22  ;;  %s2244_s29 = int_to_ptr.vmem [resolvable:$true] %s1122_s29 }
  0x40   : > { %577 = vmatpush.bf16.msra.mxu0 %v1433_v22  ;;  %1715 = vmatpush.bf16.msra.mxu2 %v1433_v22  ;;  %v1477_v60 = vld [vmem:[%s2092_s25 + $0x30] sm:$0xff]  ;;  %v1478_v62 = vld [vmem:[%s2092_s25 + $0x38] sm:$0xff]  ;;  %v1479_v0 = vld [vmem:[%s2092_s25 + $0x40] sm:$0xff]  ;;  %s1124_s6 = sshll.u32 %s1121_s28, 4  ;;  %s1139_s16 = sshll.u32 %s2121_s23, 4  ;;  %s1125_s6 = int_to_ptr.hbm [resolvable:$true] %s1124_s6  ;;  %s2247_s16 = int_to_ptr.vmem [resolvable:$true] %s1139_s16 }
  0x41   : > { %746 = vmatpush.bf16.msra.mxu1 %v1437_v23  ;;  %1723 = vmatpush.bf16.msra.mxu3 %v1437_v23  ;;  %v1493_v61 = vld [vmem:[%s2092_s25 + $0xb0] sm:$0xff]  ;;  %v1494_v63 = vld [vmem:[%s2092_s25 + $0xb8] sm:$0xff]  ;;  %v1495_v1 = vld [vmem:[%s2092_s25 + $0xc0] sm:$0xff]  ;;  %s1141_s9 = sshll.u32 %s1138_s8, 4  ;;  %s1105_s11 = scalar_lea.sflag [#allocation4], %s2086_s10  ;;  %s2249_s9 = int_to_ptr.hbm [resolvable:$true] %s1141_s9 }
  0x42   : > { %v1480_v12 = vld [vmem:[%s2092_s25 + $0x48] sm:$0xff]  ;;  %v1481_v24 = vld [vmem:[%s2092_s25 + $0x50] sm:$0xff]  ;;  %v1482_v36 = vld [vmem:[%s2092_s25 + $0x58] sm:$0xff]  ;;  %s1872_s20 = sshra.s32 %s1125_s6, 4  ;;  %s1878_s22 = scalar_lea.hbm %s2299_s2, 512  ;;  %s1873_s20 = int_to_ptr.hbm [resolvable:$true] %s1872_s20 }
  0x43   : > { %v1496_v13 = vld [vmem:[%s2092_s25 + $0xc8] sm:$0xff]  ;;  %v1497_v25 = vld [vmem:[%s2092_s25 + $0xd0] sm:$0xff]  ;;  %v1498_v37 = vld [vmem:[%s2092_s25 + $0xd8] sm:$0xff]  ;;  %p1879_p11 = scmp.lt.s32.totalorder %s1873_s20, %s2299_s2 }
  0x44   : > { %578 = vmatpush.bf16.msra.mxu0 %v1425_v28  ;;  %1716 = vmatpush.bf16.msra.mxu2 %v1425_v28 }
  0x45   : > { %747 = vmatpush.bf16.msra.mxu1 %v1429_v29  ;;  %1724 = vmatpush.bf16.msra.mxu3 %v1429_v29 }
  0x48   : > { %579 = vmatpush.bf16.msra.mxu0 %v1417_v34  ;;  %1717 = vmatpush.bf16.msra.mxu2 %v1417_v34 }
  0x49   : > { %748 = vmatpush.bf16.msra.mxu1 %v1421_v35  ;;  %1725 = vmatpush.bf16.msra.mxu3 %v1421_v35 }
  0x4c   : > { %580 = vmatpush.bf16.msra.mxu0 %v1409_v40  ;;  %1718 = vmatpush.bf16.msra.mxu2 %v1409_v40 }
  0x4d   : > { %749 = vmatpush.bf16.msra.mxu1 %v1413_v41  ;;  %1726 = vmatpush.bf16.msra.mxu3 %v1413_v41 }
  0x50   : > { %581 = vmatpush.bf16.msra.mxu0 %v1401_v46  ;;  %1719 = vmatpush.bf16.msra.mxu2 %v1401_v46 }
  0x51   : > { %750 = vmatpush.bf16.msra.mxu1 %v1405_v47  ;;  %1727 = vmatpush.bf16.msra.mxu3 %v1405_v47 }
  0x53   : > { %582 = vmatmul.bf16.vlgmr.msra.gmra.mxu0 %v1471_v48  ;;  %662 = vmatmul.bf16.vlgmr.msra.gmra.mxu2 %v1487_v49 }
  0x54   : > { %751 = vmatmul.bf16.vlgmr.msra.gmra.mxu1 %v1471_v48  ;;  %831 = vmatmul.bf16.vlgmr.msra.gmra.mxu3 %v1487_v49  ;;  %v1483_v48 = vld [vmem:[%s2092_s25 + $0x60] sm:$0xff] }
  0x55   : > { %v1499_v49 = vld [vmem:[%s2092_s25 + $0xe0] sm:$0xff] }
  0x63   : > { %587 = vmatmul.bf16.gmra.mxu0 %v1472_v50  ;;  %667 = vmatmul.bf16.gmra.mxu2 %v1488_v51 }
  0x64   : > { %756 = vmatmul.bf16.gmra.mxu1 %v1472_v50  ;;  %836 = vmatmul.bf16.gmra.mxu3 %v1488_v51 }
  0x73   : > { %592 = vmatmul.bf16.gmra.mxu0 %v1473_v52  ;;  %672 = vmatmul.bf16.gmra.mxu2 %v1489_v53 }
  0x74   : > { %761 = vmatmul.bf16.gmra.mxu1 %v1473_v52  ;;  %841 = vmatmul.bf16.gmra.mxu3 %v1489_v53 }
  0x83   : > { %597 = vmatmul.bf16.gmra.mxu0 %v1474_v54  ;;  %677 = vmatmul.bf16.gmra.mxu2 %v1490_v55 }
  0x84   : > { %766 = vmatmul.bf16.gmra.mxu1 %v1474_v54  ;;  %846 = vmatmul.bf16.gmra.mxu3 %v1490_v55 }
  0x93   : > { %602 = vmatmul.bf16.gmra.mxu0 %v1475_v56  ;;  %682 = vmatmul.bf16.gmra.mxu2 %v1491_v57 }
  0x94   : > { %771 = vmatmul.bf16.gmra.mxu1 %v1475_v56  ;;  %851 = vmatmul.bf16.gmra.mxu3 %v1491_v57 }
  0xa3   : > { %607 = vmatmul.bf16.gmra.mxu0 %v1476_v58  ;;  %687 = vmatmul.bf16.gmra.mxu2 %v1492_v59 }
  0xa4   : > { %776 = vmatmul.bf16.gmra.mxu1 %v1476_v58  ;;  %856 = vmatmul.bf16.gmra.mxu3 %v1492_v59 }
  0xb3   : > { %612 = vmatmul.bf16.gmra.mxu0 %v1477_v60  ;;  %692 = vmatmul.bf16.gmra.mxu2 %v1493_v61 }
  0xb4   : > { %781 = vmatmul.bf16.gmra.mxu1 %v1477_v60  ;;  %861 = vmatmul.bf16.gmra.mxu3 %v1493_v61  ;;  %v1484_v60 = vld [vmem:[%s2092_s25 + $0x68] sm:$0xff] }
  0xb5   : > { %v1500_v61 = vld [vmem:[%s2092_s25 + $0xe8] sm:$0xff] }
  0xc3   : > { %617 = vmatmul.bf16.gmra.mxu0 %v1478_v62  ;;  %697 = vmatmul.bf16.gmra.mxu2 %v1494_v63 }
  0xc4   : > { %786 = vmatmul.bf16.gmra.mxu1 %v1478_v62  ;;  %866 = vmatmul.bf16.gmra.mxu3 %v1494_v63 }
  0xd0   : > { %v583_v2 = vpop.f32.mrf.mxu0 }
  0xd1   : > { %v752_v3 = vpop.f32.mrf.mxu1 }
  0xd2   : > { %1040 = vst [vmem:[%s2121_s23] sm:$0xff] %v752_v3 }
  0xd3   : > { %622 = vmatmul.bf16.gmra.mxu0 %v1479_v0  ;;  %702 = vmatmul.bf16.gmra.mxu2 %v1495_v1 }
  0xd4   : > { %791 = vmatmul.bf16.gmra.mxu1 %v1479_v0  ;;  %871 = vmatmul.bf16.gmra.mxu3 %v1495_v1 }
  0xd6   : > { %v663_v4 = vpop.f32.mrf.mxu2 }
  0xd7   : > { %v832_v5 = vpop.f32.mrf.mxu3 }
  0xd8   : > { %1072 = vst [vmem:[%s2121_s23 + $0x100] sm:$0xff] %v832_v5  ;;  %v585_v6 = vpop.f32.mrf.mxu0 }
  0xd9   : > { %v1524_v7 = vpack.c.bf16 %v585_v6, %v583_v2  ;;  %v754_v8 = vpop.f32.mrf.mxu1 }
  0xda   : > { %1041 = vst [vmem:[%s2121_s23 + $0x8] sm:$0xff] %v754_v8  ;;  %v1485_v8 = vld [vmem:[%s2092_s25 + $0x70] sm:$0xff] }
  0xdb   : > { %1525 = vst [vmem:[%s2128_s17] sm:$0xff] %v1524_v7  }
  0xde   : > { %v665_v9 = vpop.f32.mrf.mxu2 }
  0xdf   : > { %v1604_v10 = vpack.c.bf16 %v665_v9, %v663_v4  ;;  %v834_v11 = vpop.f32.mrf.mxu3  ;;  %v1501_v9 = vld [vmem:[%s2092_s25 + $0xf0] sm:$0xff] }
  0xe0   : > { %1073 = vst [vmem:[%s2121_s23 + $0x108] sm:$0xff] %v834_v11  ;;  %v588_v14 = vpop.f32.mrf.mxu0 }
  0xe1   : > { %1696 = vst [vmem:[%s2128_s17 + $0x80] sm:$0xff] %v1604_v10   ;;  %v757_v15 = vpop.f32.mrf.mxu1 }
  0xe2   : > { %1042 = vst [vmem:[%s2121_s23 + $0x10] sm:$0xff] %v757_v15 }
  0xe3   : > { %627 = vmatmul.bf16.gmra.mxu0 %v1480_v12  ;;  %707 = vmatmul.bf16.gmra.mxu2 %v1496_v13 }
  0xe4   : > { %796 = vmatmul.bf16.gmra.mxu1 %v1480_v12  ;;  %876 = vmatmul.bf16.gmra.mxu3 %v1496_v13 }
  0xe6   : > { %v668_v16 = vpop.f32.mrf.mxu2 }
  0xe7   : > { %v837_v17 = vpop.f32.mrf.mxu3 }
  0xe8   : > { %1074 = vst [vmem:[%s2121_s23 + $0x110] sm:$0xff] %v837_v17  ;;  %v590_v18 = vpop.f32.mrf.mxu0 }
  0xe9   : > { %v1529_v19 = vpack.c.bf16 %v590_v18, %v588_v14  ;;  %v759_v20 = vpop.f32.mrf.mxu1 }
  0xea   : > { %1043 = vst [vmem:[%s2121_s23 + $0x18] sm:$0xff] %v759_v20  ;;  %v1486_v20 = vld [vmem:[%s2092_s25 + $0x78] sm:$0xff] }
  0xeb   : > { %1681 = vst [vmem:[%s2128_s17 + $0x8] sm:$0xff] %v1529_v19  }
  0xee   : > { %v670_v21 = vpop.f32.mrf.mxu2 }
  0xef   : > { %v1609_v22 = vpack.c.bf16 %v670_v21, %v668_v16  ;;  %v839_v23 = vpop.f32.mrf.mxu3  ;;  %v1502_v21 = vld [vmem:[%s2092_s25 + $0xf8] sm:$0xff]  ;;  %s1874_s25 = scalar_lea.hbm %s1873_s20, 256 }
  0xf0   : > { %1075 = vst [vmem:[%s2121_s23 + $0x118] sm:$0xff] %v839_v23  ;;  %v593_v26 = vpop.f32.mrf.mxu0  ;;  %p1875_p1 = scmp.ne.s32.totalorder %s1873_s20, %s1874_s25  ;;  %p1880_p9 = scmp.lt.s32.totalorder %s1878_s22, %s1874_s25 }
  0xf1   : > { %1697 = vst [vmem:[%s2128_s17 + $0x88] sm:$0xff] %v1609_v22   ;;  %v762_v27 = vpop.f32.mrf.mxu1 }
  0xf2   : > { %1044 = vst [vmem:[%s2121_s23 + $0x20] sm:$0xff] %v762_v27  ;;  %p1876_p4 = pnand %p1875_p1, %p2058_p7  ;;  %p1881_p2 = por %p1880_p9, %p1879_p11 }
  0xf3   : > { %632 = vmatmul.bf16.gmra.mxu0 %v1481_v24  ;;  %712 = vmatmul.bf16.gmra.mxu2 %v1497_v25 }
  0xf4   : > { %801 = vmatmul.bf16.gmra.mxu1 %v1481_v24  ;;  %881 = vmatmul.bf16.gmra.mxu3 %v1497_v25  ;;  %p1877_p8 = pneg %p1876_p4 }
  0xf6   : > { %v673_v28 = vpop.f32.mrf.mxu2  ;;  %p1882_p10 = pnand %p1881_p2, %p1877_p8 }
  0xf7   : > { %v842_v29 = vpop.f32.mrf.mxu3 }
  0xf8   : > { %1076 = vst [vmem:[%s2121_s23 + $0x120] sm:$0xff] %v842_v29  ;;  %v595_v30 = vpop.f32.mrf.mxu0 }
  0xf9   : > { %v1534_v31 = vpack.c.bf16 %v595_v30, %v593_v26  ;;  %v764_v32 = vpop.f32.mrf.mxu1 }
  0xfa   : > { %1045 = vst [vmem:[%s2121_s23 + $0x28] sm:$0xff] %v764_v32 }
  0xfb   : > { %1682 = vst [vmem:[%s2128_s17 + $0x10] sm:$0xff] %v1534_v31  }
  0xfe   : > { %v675_v33 = vpop.f32.mrf.mxu2 }
  0xff   : > { %v1614_v34 = vpack.c.bf16 %v675_v33, %v673_v28  ;;  %v844_v35 = vpop.f32.mrf.mxu3 }
 0x100   : > { %1077 = vst [vmem:[%s2121_s23 + $0x128] sm:$0xff] %v844_v35  ;;  %v598_v38 = vpop.f32.mrf.mxu0 }
 0x101   : > { %1698 = vst [vmem:[%s2128_s17 + $0x90] sm:$0xff] %v1614_v34   ;;  %v767_v39 = vpop.f32.mrf.mxu1 }
 0x102   : > { %1046 = vst [vmem:[%s2121_s23 + $0x30] sm:$0xff] %v767_v39 }
 0x103   : > { %637 = vmatmul.bf16.gmra.mxu0 %v1482_v36  ;;  %717 = vmatmul.bf16.gmra.mxu2 %v1498_v37 }
 0x104   : > { %806 = vmatmul.bf16.gmra.mxu1 %v1482_v36  ;;  %886 = vmatmul.bf16.gmra.mxu3 %v1498_v37 }
 0x106   : > { %v678_v40 = vpop.f32.mrf.mxu2 }
 0x107   : > { %v847_v41 = vpop.f32.mrf.mxu3 }
 0x108   : > { %1078 = vst [vmem:[%s2121_s23 + $0x130] sm:$0xff] %v847_v41  ;;  %v600_v42 = vpop.f32.mrf.mxu0 }
 0x109   : > { %v1539_v43 = vpack.c.bf16 %v600_v42, %v598_v38  ;;  %v769_v44 = vpop.f32.mrf.mxu1 }
 0x10a   : > { %1047 = vst [vmem:[%s2121_s23 + $0x38] sm:$0xff] %v769_v44 }
 0x10b   : > { %1683 = vst [vmem:[%s2128_s17 + $0x18] sm:$0xff] %v1539_v43  }
 0x10e   : > { %v680_v45 = vpop.f32.mrf.mxu2 }
 0x10f   : > { %v1619_v46 = vpack.c.bf16 %v680_v45, %v678_v40  ;;  %v849_v47 = vpop.f32.mrf.mxu3 }
 0x110   : > { %1079 = vst [vmem:[%s2121_s23 + $0x138] sm:$0xff] %v849_v47  ;;  %v603_v50 = vpop.f32.mrf.mxu0 }
 0x111   : > { %1699 = vst [vmem:[%s2128_s17 + $0x98] sm:$0xff] %v1619_v46   ;;  %v772_v51 = vpop.f32.mrf.mxu1 }
 0x112   : > { %1048 = vst [vmem:[%s2121_s23 + $0x40] sm:$0xff] %v772_v51 }
 0x113   : > { %642 = vmatmul.bf16.gmra.mxu0 %v1483_v48  ;;  %722 = vmatmul.bf16.gmra.mxu2 %v1499_v49 }
 0x114   : > { %811 = vmatmul.bf16.gmra.mxu1 %v1483_v48  ;;  %891 = vmatmul.bf16.gmra.mxu3 %v1499_v49 }
 0x116   : > { %v683_v52 = vpop.f32.mrf.mxu2 }
 0x117   : > { %v852_v53 = vpop.f32.mrf.mxu3 }
 0x118   : > { %1080 = vst [vmem:[%s2121_s23 + $0x140] sm:$0xff] %v852_v53  ;;  %v605_v54 = vpop.f32.mrf.mxu0 }
 0x119   : > { %v1544_v55 = vpack.c.bf16 %v605_v54, %v603_v50  ;;  %v774_v56 = vpop.f32.mrf.mxu1 }
 0x11a   : > { %1049 = vst [vmem:[%s2121_s23 + $0x48] sm:$0xff] %v774_v56 }
 0x11b   : > { %1684 = vst [vmem:[%s2128_s17 + $0x20] sm:$0xff] %v1544_v55  }
 0x11e   : > { %v685_v57 = vpop.f32.mrf.mxu2 }
 0x11f   : > { %v1624_v58 = vpack.c.bf16 %v685_v57, %v683_v52  ;;  %v854_v59 = vpop.f32.mrf.mxu3 }
 0x120   : > { %1081 = vst [vmem:[%s2121_s23 + $0x148] sm:$0xff] %v854_v59  ;;  %v608_v62 = vpop.f32.mrf.mxu0 }
 0x121   : > { %1700 = vst [vmem:[%s2128_s17 + $0xa0] sm:$0xff] %v1624_v58   ;;  %v777_v63 = vpop.f32.mrf.mxu1 }
 0x122   : > { %1050 = vst [vmem:[%s2121_s23 + $0x50] sm:$0xff] %v777_v63 }
 0x123   : > { %647 = vmatmul.bf16.gmra.mxu0 %v1484_v60  ;;  %727 = vmatmul.bf16.gmra.mxu2 %v1500_v61 }
 0x124   : > { %816 = vmatmul.bf16.gmra.mxu1 %v1484_v60  ;;  %896 = vmatmul.bf16.gmra.mxu3 %v1500_v61 }
 0x126   : > { %v688_v0 = vpop.f32.mrf.mxu2 }
 0x127   : > { %v857_v1 = vpop.f32.mrf.mxu3 }
 0x128   : > { %1082 = vst [vmem:[%s2121_s23 + $0x150] sm:$0xff] %v857_v1  ;;  %v610_v2 = vpop.f32.mrf.mxu0 }
 0x129   : > { %v1549_v3 = vpack.c.bf16 %v610_v2, %v608_v62  ;;  %v779_v4 = vpop.f32.mrf.mxu1 }
 0x12a   : > { %1051 = vst [vmem:[%s2121_s23 + $0x58] sm:$0xff] %v779_v4 }
 0x12b   : > { %1685 = vst [vmem:[%s2128_s17 + $0x28] sm:$0xff] %v1549_v3  }
 0x12e   : > { %v690_v5 = vpop.f32.mrf.mxu2 }
 0x12f   : > { %v1629_v6 = vpack.c.bf16 %v690_v5, %v688_v0  ;;  %v859_v7 = vpop.f32.mrf.mxu3 }
 0x130   : > { %1083 = vst [vmem:[%s2121_s23 + $0x158] sm:$0xff] %v859_v7  ;;  %v613_v10 = vpop.f32.mrf.mxu0 }
 0x131   : > { %1701 = vst [vmem:[%s2128_s17 + $0xa8] sm:$0xff] %v1629_v6   ;;  %v782_v11 = vpop.f32.mrf.mxu1 }
 0x132   : > { %1052 = vst [vmem:[%s2121_s23 + $0x60] sm:$0xff] %v782_v11 }
 0x133   : > { %652 = vmatmul.bf16.gmra.mxu0 %v1485_v8  ;;  %732 = vmatmul.bf16.gmra.mxu2 %v1501_v9 }
 0x134   : > { %821 = vmatmul.bf16.gmra.mxu1 %v1485_v8  ;;  %901 = vmatmul.bf16.gmra.mxu3 %v1501_v9 }
 0x136   : > { %v693_v12 = vpop.f32.mrf.mxu2 }
 0x137   : > { %v862_v13 = vpop.f32.mrf.mxu3 }
 0x138   : > { %1084 = vst [vmem:[%s2121_s23 + $0x160] sm:$0xff] %v862_v13  ;;  %v615_v14 = vpop.f32.mrf.mxu0 }
 0x139   : > { %v1554_v15 = vpack.c.bf16 %v615_v14, %v613_v10  ;;  %v784_v16 = vpop.f32.mrf.mxu1 }
 0x13a   : > { %1053 = vst [vmem:[%s2121_s23 + $0x68] sm:$0xff] %v784_v16 }
 0x13b   : > { %1686 = vst [vmem:[%s2128_s17 + $0x30] sm:$0xff] %v1554_v15  }
 0x13e   : > { %v695_v17 = vpop.f32.mrf.mxu2 }
 0x13f   : > { %v1634_v18 = vpack.c.bf16 %v695_v17, %v693_v12  ;;  %v864_v19 = vpop.f32.mrf.mxu3 }
 0x140   : > { %1085 = vst [vmem:[%s2121_s23 + $0x168] sm:$0xff] %v864_v19  ;;  %v618_v22 = vpop.f32.mrf.mxu0 }
 0x141   : > { %1702 = vst [vmem:[%s2128_s17 + $0xb0] sm:$0xff] %v1634_v18   ;;  %v787_v23 = vpop.f32.mrf.mxu1 }
 0x142   : > { %1054 = vst [vmem:[%s2121_s23 + $0x70] sm:$0xff] %v787_v23 }
 0x143   : > { %657 = vmatmul.bf16.gmra.mxu0 %v1486_v20  ;;  %737 = vmatmul.bf16.gmra.mxu2 %v1502_v21 }
 0x144   : > { %826 = vmatmul.bf16.gmra.mxu1 %v1486_v20  ;;  %906 = vmatmul.bf16.gmra.mxu3 %v1502_v21 }
 0x146   : > { %v698_v24 = vpop.f32.mrf.mxu2 }
 0x147   : > { %v867_v25 = vpop.f32.mrf.mxu3 }
 0x148   : > { %1086 = vst [vmem:[%s2121_s23 + $0x170] sm:$0xff] %v867_v25  ;;  %v620_v26 = vpop.f32.mrf.mxu0 }
 0x149   : > { %v1559_v27 = vpack.c.bf16 %v620_v26, %v618_v22  ;;  %v789_v28 = vpop.f32.mrf.mxu1 }
 0x14a   : > { %1055 = vst [vmem:[%s2121_s23 + $0x78] sm:$0xff] %v789_v28 }
 0x14b   : > { %1687 = vst [vmem:[%s2128_s17 + $0x38] sm:$0xff] %v1559_v27  }
 0x14e   : > { %v700_v29 = vpop.f32.mrf.mxu2 }
 0x14f   : > { %v1639_v30 = vpack.c.bf16 %v700_v29, %v698_v24  ;;  %v869_v31 = vpop.f32.mrf.mxu3 }
 0x150   : > { %1087 = vst [vmem:[%s2121_s23 + $0x178] sm:$0xff] %v869_v31  ;;  %v623_v32 = vpop.f32.mrf.mxu0 }
 0x151   : > { %1703 = vst [vmem:[%s2128_s17 + $0xb8] sm:$0xff] %v1639_v30   ;;  %v792_v33 = vpop.f32.mrf.mxu1 }
 0x152   : > { %1056 = vst [vmem:[%s2121_s23 + $0x80] sm:$0xff] %v792_v33 }
 0x156   : > { %v703_v34 = vpop.f32.mrf.mxu2 }
 0x157   : > { %v872_v35 = vpop.f32.mrf.mxu3 }
 0x158   : > { %1088 = vst [vmem:[%s2121_s23 + $0x180] sm:$0xff] %v872_v35  ;;  %v625_v36 = vpop.f32.mrf.mxu0 }
 0x159   : > { %v1564_v37 = vpack.c.bf16 %v625_v36, %v623_v32  ;;  %v794_v38 = vpop.f32.mrf.mxu1 }
 0x15a   : > { %1057 = vst [vmem:[%s2121_s23 + $0x88] sm:$0xff] %v794_v38 }
 0x15b   : > { %1688 = vst [vmem:[%s2128_s17 + $0x40] sm:$0xff] %v1564_v37  }
 0x15e   : > { %v705_v39 = vpop.f32.mrf.mxu2 }
 0x15f   : > { %v1644_v40 = vpack.c.bf16 %v705_v39, %v703_v34  ;;  %v874_v41 = vpop.f32.mrf.mxu3 }
 0x160   : > { %1089 = vst [vmem:[%s2121_s23 + $0x188] sm:$0xff] %v874_v41  ;;  %v628_v42 = vpop.f32.mrf.mxu0 }
 0x161   : > { %1704 = vst [vmem:[%s2128_s17 + $0xc0] sm:$0xff] %v1644_v40   ;;  %v797_v43 = vpop.f32.mrf.mxu1 }
 0x162   : > { %1058 = vst [vmem:[%s2121_s23 + $0x90] sm:$0xff] %v797_v43 }
 0x166   : > { %v708_v44 = vpop.f32.mrf.mxu2 }
 0x167   : > { %v877_v45 = vpop.f32.mrf.mxu3 }
 0x168   : > { %1090 = vst [vmem:[%s2121_s23 + $0x190] sm:$0xff] %v877_v45  ;;  %v630_v46 = vpop.f32.mrf.mxu0 }
 0x169   : > { %v1569_v47 = vpack.c.bf16 %v630_v46, %v628_v42  ;;  %v799_v48 = vpop.f32.mrf.mxu1 }
 0x16a   : > { %1059 = vst [vmem:[%s2121_s23 + $0x98] sm:$0xff] %v799_v48 }
 0x16b   : > { %1689 = vst [vmem:[%s2128_s17 + $0x48] sm:$0xff] %v1569_v47  }
 0x16e   : > { %v710_v49 = vpop.f32.mrf.mxu2 }
 0x16f   : > { %v1649_v50 = vpack.c.bf16 %v710_v49, %v708_v44  ;;  %v879_v51 = vpop.f32.mrf.mxu3 }
 0x170   : > { %1091 = vst [vmem:[%s2121_s23 + $0x198] sm:$0xff] %v879_v51  ;;  %v633_v52 = vpop.f32.mrf.mxu0 }
 0x171   : > { %1705 = vst [vmem:[%s2128_s17 + $0xc8] sm:$0xff] %v1649_v50   ;;  %v802_v53 = vpop.f32.mrf.mxu1 }
 0x172   : > { %1060 = vst [vmem:[%s2121_s23 + $0xa0] sm:$0xff] %v802_v53 }
 0x176   : > { %v713_v54 = vpop.f32.mrf.mxu2 }
 0x177   : > { %v882_v55 = vpop.f32.mrf.mxu3 }
 0x178   : > { %1092 = vst [vmem:[%s2121_s23 + $0x1a0] sm:$0xff] %v882_v55  ;;  %v635_v56 = vpop.f32.mrf.mxu0 }
 0x179   : > { %v1574_v57 = vpack.c.bf16 %v635_v56, %v633_v52  ;;  %v804_v58 = vpop.f32.mrf.mxu1 }
 0x17a   : > { %1061 = vst [vmem:[%s2121_s23 + $0xa8] sm:$0xff] %v804_v58 }
 0x17b   : > { %1690 = vst [vmem:[%s2128_s17 + $0x50] sm:$0xff] %v1574_v57  }
 0x17e   : > { %v715_v59 = vpop.f32.mrf.mxu2 }
 0x17f   : > { %v1654_v60 = vpack.c.bf16 %v715_v59, %v713_v54  ;;  %v884_v61 = vpop.f32.mrf.mxu3 }
 0x180   : > { %1093 = vst [vmem:[%s2121_s23 + $0x1a8] sm:$0xff] %v884_v61  ;;  %v638_v62 = vpop.f32.mrf.mxu0 }
 0x181   : > { %1706 = vst [vmem:[%s2128_s17 + $0xd0] sm:$0xff] %v1654_v60   ;;  %v807_v63 = vpop.f32.mrf.mxu1 }
 0x182   : > { %1062 = vst [vmem:[%s2121_s23 + $0xb0] sm:$0xff] %v807_v63 }
 0x186   : > { %v718_v0 = vpop.f32.mrf.mxu2 }
 0x187   : > { %v887_v1 = vpop.f32.mrf.mxu3 }
 0x188   : > { %1094 = vst [vmem:[%s2121_s23 + $0x1b0] sm:$0xff] %v887_v1  ;;  %v640_v2 = vpop.f32.mrf.mxu0 }
 0x189   : > { %v1579_v3 = vpack.c.bf16 %v640_v2, %v638_v62  ;;  %v809_v4 = vpop.f32.mrf.mxu1 }
 0x18a   : > { %1063 = vst [vmem:[%s2121_s23 + $0xb8] sm:$0xff] %v809_v4 }
 0x18b   : > { %1691 = vst [vmem:[%s2128_s17 + $0x58] sm:$0xff] %v1579_v3  }
 0x18e   : > { %v720_v5 = vpop.f32.mrf.mxu2 }
 0x18f   : > { %v1659_v6 = vpack.c.bf16 %v720_v5, %v718_v0  ;;  %v889_v7 = vpop.f32.mrf.mxu3 }
 0x190   : > { %1095 = vst [vmem:[%s2121_s23 + $0x1b8] sm:$0xff] %v889_v7  ;;  %v643_v8 = vpop.f32.mrf.mxu0 }
 0x191   : > { %1707 = vst [vmem:[%s2128_s17 + $0xd8] sm:$0xff] %v1659_v6   ;;  %v812_v9 = vpop.f32.mrf.mxu1 }
 0x192   : > { %1064 = vst [vmem:[%s2121_s23 + $0xc0] sm:$0xff] %v812_v9 }
 0x196   : > { %v723_v10 = vpop.f32.mrf.mxu2 }
 0x197   : > { %v892_v11 = vpop.f32.mrf.mxu3 }
 0x198   : > { %1096 = vst [vmem:[%s2121_s23 + $0x1c0] sm:$0xff] %v892_v11  ;;  %v645_v12 = vpop.f32.mrf.mxu0 }
 0x199   : > { %v1584_v13 = vpack.c.bf16 %v645_v12, %v643_v8  ;;  %v814_v14 = vpop.f32.mrf.mxu1 }
 0x19a   : > { %1065 = vst [vmem:[%s2121_s23 + $0xc8] sm:$0xff] %v814_v14 }
 0x19b   : > { %1692 = vst [vmem:[%s2128_s17 + $0x60] sm:$0xff] %v1584_v13  }
 0x19e   : > { %v725_v15 = vpop.f32.mrf.mxu2 }
 0x19f   : > { %v1664_v16 = vpack.c.bf16 %v725_v15, %v723_v10  ;;  %v894_v17 = vpop.f32.mrf.mxu3 }
 0x1a0   : > { %1097 = vst [vmem:[%s2121_s23 + $0x1c8] sm:$0xff] %v894_v17  ;;  %v648_v18 = vpop.f32.mrf.mxu0 }
 0x1a1   : > { %1708 = vst [vmem:[%s2128_s17 + $0xe0] sm:$0xff] %v1664_v16   ;;  %v817_v19 = vpop.f32.mrf.mxu1 }
 0x1a2   : > { %1066 = vst [vmem:[%s2121_s23 + $0xd0] sm:$0xff] %v817_v19 }
 0x1a6   : > { %v728_v20 = vpop.f32.mrf.mxu2 }
 0x1a7   : > { %v897_v21 = vpop.f32.mrf.mxu3 }
 0x1a8   : > { %1098 = vst [vmem:[%s2121_s23 + $0x1d0] sm:$0xff] %v897_v21  ;;  %v650_v22 = vpop.f32.mrf.mxu0 }
 0x1a9   : > { %v1589_v23 = vpack.c.bf16 %v650_v22, %v648_v18  ;;  %v819_v24 = vpop.f32.mrf.mxu1 }
 0x1aa   : > { %1067 = vst [vmem:[%s2121_s23 + $0xd8] sm:$0xff] %v819_v24 }
 0x1ab   : > { %1693 = vst [vmem:[%s2128_s17 + $0x68] sm:$0xff] %v1589_v23  }
 0x1ae   : > { %v730_v25 = vpop.f32.mrf.mxu2 }
 0x1af   : > { %v1669_v26 = vpack.c.bf16 %v730_v25, %v728_v20  ;;  %v899_v27 = vpop.f32.mrf.mxu3 }
 0x1b0   : > { %1099 = vst [vmem:[%s2121_s23 + $0x1d8] sm:$0xff] %v899_v27  ;;  %v653_v28 = vpop.f32.mrf.mxu0 }
 0x1b1   : > { %1709 = vst [vmem:[%s2128_s17 + $0xe8] sm:$0xff] %v1669_v26   ;;  %v822_v29 = vpop.f32.mrf.mxu1 }
 0x1b2   : > { %1068 = vst [vmem:[%s2121_s23 + $0xe0] sm:$0xff] %v822_v29 }
 0x1b6   : > { %v733_v30 = vpop.f32.mrf.mxu2 }
 0x1b7   : > { %v902_v31 = vpop.f32.mrf.mxu3 }
 0x1b8   : > { %1100 = vst [vmem:[%s2121_s23 + $0x1e0] sm:$0xff] %v902_v31  ;;  %v655_v32 = vpop.f32.mrf.mxu0 }
 0x1b9   : > { %v1594_v33 = vpack.c.bf16 %v655_v32, %v653_v28  ;;  %v824_v34 = vpop.f32.mrf.mxu1 }
 0x1ba   : > { %1069 = vst [vmem:[%s2121_s23 + $0xe8] sm:$0xff] %v824_v34 }
 0x1bb   : > { %1694 = vst [vmem:[%s2128_s17 + $0x70] sm:$0xff] %v1594_v33  }
 0x1be   : > { %v735_v35 = vpop.f32.mrf.mxu2 }
 0x1bf   : > { %v1674_v36 = vpack.c.bf16 %v735_v35, %v733_v30  ;;  %v904_v37 = vpop.f32.mrf.mxu3 }
 0x1c0   : > { %1101 = vst [vmem:[%s2121_s23 + $0x1e8] sm:$0xff] %v904_v37  ;;  %v658_v38 = vpop.f32.mrf.mxu0 }
 0x1c1   : > { %1710 = vst [vmem:[%s2128_s17 + $0xf0] sm:$0xff] %v1674_v36   ;;  %v827_v39 = vpop.f32.mrf.mxu1 }
 0x1c2   : > { %1070 = vst [vmem:[%s2121_s23 + $0xf0] sm:$0xff] %v827_v39 }
 0x1c6   : > { %v738_v40 = vpop.f32.mrf.mxu2 }
 0x1c7   : > { %v907_v41 = vpop.f32.mrf.mxu3 }
 0x1c8   : > { %1102 = vst [vmem:[%s2121_s23 + $0x1f0] sm:$0xff] %v907_v41  ;;  %v660_v42 = vpop.f32.mrf.mxu0 }
 0x1c9   : > { %v1599_v43 = vpack.c.bf16 %v660_v42, %v658_v38  ;;  %v829_v44 = vpop.f32.mrf.mxu1 }
 0x1ca   : > { %1071 = vst [vmem:[%s2121_s23 + $0xf8] sm:$0xff] %v829_v44 }
 0x1cb   : > { %1695 = vst [vmem:[%s2128_s17 + $0x78] sm:$0xff] %v1599_v43  }
 0x1ce   : > { %v740_v45 = vpop.f32.mrf.mxu2 }
 0x1cf   : > { %v1679_v46 = vpack.c.bf16 %v740_v45, %v738_v40  ;;  %v909_v47 = vpop.f32.mrf.mxu3 }
 0x1d0   : > { %1103 = vst [vmem:[%s2121_s23 + $0x1f8] sm:$0xff] %v909_v47 }
 0x1d1   : > { %1711 = vst [vmem:[%s2128_s17 + $0xf8] sm:$0xff] %v1679_v46  }
 0x1d2   : > { %1885 = shalt.err (!%p1882_p10)
}
 0x1d3   : > { %s1967_s23 = smov 64   ;;  %s1968_s17 = smov 4  }
 0x1d4   : > { %1734 = dma.vmem_to_hbm [thread:$0]  (%p2058_p7), %s2244_s29, 4096, %s1125_s6, %s1105_s11, %s1967_s23, %s1967_s23, %s1968_s17  }
 0x1d5   : > { %s1110_s28 = scalar_lea.sflag [#allocation9], %s2086_s10  ;;  %s1900_s30 = sshra.s32 %s2249_s9, 4  ;;  %s1901_s30 = int_to_ptr.hbm [resolvable:$true] %s1900_s30 }
 0x1d6   : > { %s1902_s7 = scalar_lea.hbm %s1901_s30, 512  ;;  %s1906_s25 = scalar_lea.hbm %s2300_s3, 1024 }
 0x1d7   : > { %p1903_p12 = scmp.ne.s32.totalorder %s1901_s30, %s1902_s7  ;;  %p1907_p3 = scmp.lt.s32.totalorder %s1901_s30, %s2300_s3 }
 0x1d8   : > { %p1908_p5 = scmp.lt.s32.totalorder %s1906_s25, %s1902_s7 }
 0x1d9   : > { %p1904_p13 = pnand %p1903_p12, %p2058_p7 }
 0x1da   : > { %p1909_p1 = por %p1908_p5, %p1907_p3 }
 0x1db   : > { %p1905_p0 = pneg %p1904_p13 }
 0x1dd   : > { %p1910_p4 = pnand %p1909_p1, %p1905_p0 }
 0x1df   : > { %1913 = shalt.err (!%p1910_p4)
}
 0x1e0   : > { %s1969_s10 = smov 128   ;;  %s1970_s29 = smov 8  }
 0x1e1   : > { %1735 = dma.vmem_to_hbm [thread:$0]  (%p2058_p7), %s2247_s16, 8192, %s2249_s9, %s1110_s28, %s1969_s10, %s1969_s10, %s1970_s29  }
 0x1e2 PF: > { %s1156_s6 = sand.u32 1, %s1948_s12   ;;  %p2306_p8 = scmp.ge.s32.totalorder %s1960_s15, 2 }
 0x1e3   : > { %s1157_s11 = scalar_lea.sflag [#allocation4], %s1156_s6 }
 0x1e4   : > { %p1747_p11 = pnand %p2306_p8, %p2026_p6 }
 0x1e6   : > { %p1748_p9 = pneg %p1747_p11 }
 0x1e8   : > { %1939 = dma.done.wait (%p1748_p9), %s1157_s11, 4096  }
 0x1e9   : > { %1941 = vsyncadd (%p1748_p9), %s1157_s11, 4294963200  ;;  %s1167_s22 = scalar_lea.sflag [#allocation9], %s1156_s6 }
 0x1ea   : > { %1943 = dma.done.wait (%p1748_p9), %s1167_s22, 8192  }
 0x1eb   : > { %1945 = vsyncadd (%p1748_p9), %s1167_s22, 4294959104  ;;  %p21_p7 = scmp.ge.s32.totalorder %s2044_s26, 4   ;;  %s2307_s12 = smov %s1952_s13 }
 0x1ec   : > { %s2308_s13 = smov %s1956_s14  ;;  %s2309_s14 = smov %s2054_s4 }
 0x1ed   : > { %s2310_s15 = smov %s2044_s26  ;;  %23 = sbr.rel (!%p21_p7) target bundleno = 8 (0x8), region = 94 }
 0x1f2   :  { %1173 = vsyncpa [#allocation3], 1 }
 0x1f3   :  { %1175 = vsyncpa [#allocation3 + $0x1], 1 }
 0x1f4   :  { %1176 = vsyncpa [#allocation6], 1 }
 0x1f5   :  { %1177 = vsyncpa [#allocation4], 1 }
 0x1f6   :  { %1179 = vsyncpa [#allocation4 + $0x1], 1 }
 0x1f7   :  { %1180 = vsyncpa [#allocation9], 1 }
 0x1f8   :  { %1182 = vsyncpa [#allocation9 + $0x1], 1 }

</bundles_post_ra>
